<compile_context>
chip_gen: v7x
topology: tpu7x:2x2x1
jax: 0.10.0
libtpu: 0.0.40
codegen_flags: <defaults>
</compile_context>

<pallas_src>
import numpy as np
import jax
import jax.numpy as jnp
from jax.experimental import pallas as pl
from jax.experimental.pallas import tpu as pltpu

Z, H, NUM_FLOWS = 16, 32, 2        # H must be a multiple of Z (MADE mask)
B = 256                            # batch (multiple of 128: batch rides the lane axis)
FORGET_BIAS = 1.0
OUT_ROWS = Z + 1                   # rows 0..Z-1: z, row Z: logdet


def build_mask(n_in, n_out, diagonal_zeros=False):
    """MADE mask identical to MaskedLinear.build_mask in the PyTorch code."""
    mask = np.ones((n_in, n_out), dtype=np.float32)
    if n_out >= n_in:
        k = n_out // n_in
        for i in range(n_in):
            mask[i + 1:, i * k:(i + 1) * k] = 0
            if diagonal_zeros:
                mask[i:i + 1, i * k:(i + 1) * k] = 0
    else:
        k = n_in // n_out
        for i in range(n_out):
            mask[(i + 1) * k:, i:i + 1] = 0
            if diagonal_zeros:
                mask[i * k:(i + 1) * k:, i:i + 1] = 0
    return mask


def iaf_kernel(z_ref, hc_ref, w1_ref, w2_ref, b_ref, p_ref, out_ref):
    # Batch on the 128-lane axis, features on sublanes.
    z = z_ref[...].astype(jnp.float32)            # (Z, TB)  state kept in f32
    hc = hc_ref[...].astype(jnp.float32)          # (H, TB)
    logdet = jnp.zeros((1, z.shape[1]), jnp.float32)

    for f in range(NUM_FLOWS):                    # static unroll: flows are sequential in z
        b_all = b_ref[f]                          # (H + 2Z, 1) f32
        b1 = b_all[:H, :]                         # (H, 1)
        b2 = b_all[H:, :]                         # (2Z, 1)  forget_bias already folded in

        # h = ELU(W1^T z + b1) + h_context        (num_hidden = 0 -> identity zh_feats)
        a = jnp.dot(w1_ref[f], z.astype(jnp.bfloat16),
                    preferred_element_type=jnp.float32) + b1
        h = jnp.where(a > 0, a, jnp.exp(jnp.minimum(a, 0.0)) - 1.0) + hc   # ELU(alpha=1)

        # fused mean/std matmul: rows [:Z] = mean, rows [Z:] = pre-gate logits s
        ms = jnp.dot(w2_ref[f], h.astype(jnp.bfloat16),
                     preferred_element_type=jnp.float32) + b2
        mean = ms[:Z, :]
        s = ms[Z:, :]

        # gate = sigmoid(s), log(gate) = log_sigmoid(s): one exp + one log on the EUP,
        # approximate reciprocal (near-free vrcp) instead of a second exp.
        t = jnp.exp(-jnp.abs(s))
        log_gate = jnp.minimum(s, 0.0) - jnp.log(1.0 + t)
        gate_pos = pl.reciprocal(1.0 + t, approx=True)
        gate = jnp.where(s >= 0, gate_pos, t * gate_pos)

        z = gate * z + (1.0 - gate) * mean
        logdet = logdet + jnp.sum(log_gate, axis=0, keepdims=True)

    # Net permutation (even-flow flips folded out of the loop), applied on the MXU.
    out_ref[:Z, :] = jnp.dot(p_ref[...], z, preferred_element_type=jnp.float32)
    out_ref[Z:, :] = logdet                       # single logdet row, no broadcast


def prepare_params(wz, bz, wm, bm, ws, bs, forget_bias=FORGET_BIAS):
    """Fold the even-flow column flips into the weights, fuse the mean/std matmuls,
    fold the forget bias into the fused (f32) bias, transpose everything for the
    batch-on-lanes layout, and build the (Z, Z) matrix of the net permutation."""
    num_flows, z_size, h_size = wz.shape
    flip_idx = np.arange(z_size - 1, -1, -1)
    perm = np.arange(z_size)                     # actual_z = pmat @ y, y = kernel state
    w1_l, w2_l, b_l = [], [], []
    for f in range(num_flows):
        if (f + 1) % 2 == 0:
            perm = perm[flip_idx]
        inv_p = np.argsort(perm)
        wz_f = np.asarray(wz[f])[inv_p, :]                     # (Z, H)  input rows permuted
        wm_f = np.asarray(wm[f])[:, inv_p]                     # (H, Z)  output cols permuted
        ws_f = np.asarray(ws[f])[:, inv_p]
        w1_l.append(wz_f.T)                                    # (H, Z):   h  = W1T @ z
        w2_l.append(np.concatenate([wm_f, ws_f], axis=1).T)    # (2Z, H):  ms = W2T @ h
        b1_f = np.asarray(bz[f]).reshape(h_size, 1)
        b2_f = np.concatenate(
            [np.asarray(bm[f]).reshape(-1)[inv_p],
             np.asarray(bs[f]).reshape(-1)[inv_p] + forget_bias]).reshape(2 * z_size, 1)
        b_l.append(np.concatenate([b1_f, b2_f], axis=0))       # (H + 2Z, 1)
    w1t = jnp.asarray(np.stack(w1_l), dtype=jnp.bfloat16)      # (F, H, Z)    bf16 MXU operand
    w2t = jnp.asarray(np.stack(w2_l), dtype=jnp.bfloat16)      # (F, 2Z, H)   bf16 MXU operand
    bias = jnp.asarray(np.stack(b_l), dtype=jnp.float32)       # (F, H+2Z, 1) f32 (precision)
    pmat = jnp.asarray(np.eye(z_size, dtype=np.float32)[perm]) # (Z, Z): actual_z = pmat @ y
    return w1t, w2t, bias, pmat


def _pick_tile_b(batch):
    """Largest multiple-of-128 batch tile (<=512 rows/step) that divides the batch,
    preferring >=2 grid steps so v7x megacore sharding / DMA pipelining have work."""
    assert batch % 128 == 0, "batch must be a multiple of 128 (batch rides the lane axis)"
    candidates = [t for t in range(512, 0, -128) if batch % t == 0]
    for t in candidates:
        if batch // t >= 2:
            return t
    return candidates[0]


def iaf_forward(z, h_context, packed_params):
    w1t, w2t, bias, pmat = packed_params
    batch = z.shape[0]
    tile_b = _pick_tile_b(batch)
    grid = (batch // tile_b,)

    # Layout plumbing only: batch-on-lanes + bf16 for the streamed activations.
    zt = z.T.astype(jnp.bfloat16)              # (Z, B)
    hct = h_context.T.astype(jnp.bfloat16)     # (H, B)

    out = pl.pallas_call(
        iaf_kernel,
        out_shape=jax.ShapeDtypeStruct((OUT_ROWS, batch), jnp.float32),
        grid_spec=pltpu.PrefetchScalarGridSpec(
            num_scalar_prefetch=0,
            grid=grid,
            in_specs=[
                pl.BlockSpec((Z, tile_b), lambda i: (0, i)),                    # z (streamed)
                pl.BlockSpec((H, tile_b), lambda i: (0, i)),                    # h_context (streamed)
                pl.BlockSpec((NUM_FLOWS, H, Z), lambda i: (0, 0, 0)),           # W1^T (resident)
                pl.BlockSpec((NUM_FLOWS, 2 * Z, H), lambda i: (0, 0, 0)),       # W2^T fused (resident)
                pl.BlockSpec((NUM_FLOWS, H + 2 * Z, 1), lambda i: (0, 0, 0)),   # biases (resident)
                pl.BlockSpec((Z, Z), lambda i: (0, 0)),                         # net perm (resident)
            ],
            out_specs=pl.BlockSpec((OUT_ROWS, tile_b), lambda i: (0, i)),
        ),
        compiler_params=pltpu.CompilerParams(
            dimension_semantics=("parallel",)),
    )(zt, hct, w1t, w2t, bias, pmat)

    z_out = out[:Z, :].T                       # (B, Z), already in original column order
    logdet = out[Z, :]                         # (B,)
    return z_out, logdet


def iaf_reference(z, hc, wz, bz, wm, bm, ws, bs):
    """Plain-JAX f32 reference mirroring the PyTorch forward (original, unfolded params)."""
    flip_idx = np.arange(Z - 1, -1, -1)
    logdet = jnp.zeros((z.shape[0],), jnp.float32)
    for f in range(NUM_FLOWS):
        if (f + 1) % 2 == 0:
            z = z[:, flip_idx]
        h = jax.nn.elu(z @ wz[f] + bz[f]) + hc
        mean = h @ wm[f] + bm[f]
        gate = jax.nn.sigmoid(h @ ws[f] + bs[f] + FORGET_BIAS)
        z = gate * z + (1 - gate) * mean
        logdet = logdet + jnp.sum(jnp.log(gate), axis=1)
    return z, logdet


if __name__ == "__main__":
    key = jax.random.PRNGKey(0)
    ks = jax.random.split(key, 8)

    # MADE masks (same rules as MaskedLinear): z->h (no diag zeros), h->z (diag zeros)
    mask_z = jnp.asarray(build_mask(Z, H, diagonal_zeros=False))
    mask_out = jnp.asarray(build_mask(H, Z, diagonal_zeros=True))

    # Deterministic synthetic parameters (mask applied once, host-side).
    wz = jax.random.normal(ks[0], (NUM_FLOWS, Z, H), jnp.float32) * 0.1 * mask_z[None]
    bz = jax.random.normal(ks[1], (NUM_FLOWS, 1, H), jnp.float32) * 0.01
    wm = jax.random.normal(ks[2], (NUM_FLOWS, H, Z), jnp.float32) * 0.1 * mask_out[None]
    bm = jax.random.normal(ks[3], (NUM_FLOWS, 1, Z), jnp.float32) * 0.01
    ws = jax.random.normal(ks[4], (NUM_FLOWS, H, Z), jnp.float32) * 0.1 * mask_out[None]
    bs = jax.random.normal(ks[5], (NUM_FLOWS, 1, Z), jnp.float32) * 0.01

    packed = prepare_params(wz, bz, wm, bm, ws, bs)

    z = jax.random.normal(ks[6], (B, Z), jnp.float32)
    h_context = jax.random.normal(ks[7], (B, H), jnp.float32)

    z_out, logdets = iaf_forward(z, h_context, packed)
    jax.block_until_ready((z_out, logdets))

    # Tolerances account for bf16 streamed activations + bf16 MXU operands
    # (f32 accumulation / f32 elementwise math inside the kernel).
    z_ref, ld_ref = iaf_reference(z, h_context, wz, bz, wm, bm, ws, bs)
    assert np.allclose(np.asarray(z_out), np.asarray(z_ref), rtol=3e-2, atol=3e-2), "z mismatch"
    assert np.allclose(np.asarray(logdets), np.asarray(ld_ref), rtol=3e-2, atol=5e-2), "logdet mismatch"

    print("KERNEL_OK")
</pallas_src>

<mosaic_0001>
module attributes {stable_mosaic.version = 11 : i64} {
  func.func @iaf_kernel(%arg0: i32, %arg1: memref<16x128xbf16, #tpu.memory_space<vmem>>, %arg2: memref<32x128xbf16, #tpu.memory_space<vmem>>, %arg3: memref<2x32x16xbf16, #tpu.memory_space<vmem>>, %arg4: memref<2x32x32xbf16, #tpu.memory_space<vmem>>, %arg5: memref<2x64x1xf32, #tpu.memory_space<vmem>>, %arg6: memref<16x16xf32, #tpu.memory_space<vmem>>, %arg7: memref<17x128xf32, #tpu.memory_space<vmem>>) attributes {dimension_semantics = [#tpu.dimension_semantics<parallel>], iteration_bounds = array<i64: 2>, scalar_prefetch = 0 : i64, scratch_operands = 0 : i64, tpu.core_type = #tpu.core_type<tc>, window_params = [{transform_indices = @transform_0, window_bounds = array<i64: 16, 128>}, {transform_indices = @transform_1, window_bounds = array<i64: 32, 128>}, {pipeline_mode = #tpu.pipeline_mode<synchronous>, transform_indices = @transform_2, window_bounds = array<i64: 2, 32, 16>}, {pipeline_mode = #tpu.pipeline_mode<synchronous>, transform_indices = @transform_3, window_bounds = array<i64: 2, 32, 32>}, {pipeline_mode = #tpu.pipeline_mode<synchronous>, transform_indices = @transform_4, window_bounds = array<i64: 2, 64, 1>}, {pipeline_mode = #tpu.pipeline_mode<synchronous>, transform_indices = @transform_5, window_bounds = array<i64: 16, 16>}, {transform_indices = @transform_6, window_bounds = array<i64: 17, 128>}]} {
    %c0 = arith.constant 0 : index
    %c0_0 = arith.constant 0 : index
    %0 = vector.load %arg1[%c0, %c0_0] : memref<16x128xbf16, #tpu.memory_space<vmem>>, vector<16x128xbf16>
    %1 = arith.extf %0 : vector<16x128xbf16> to vector<16x128xf32>
    %c0_1 = arith.constant 0 : index
    %c0_2 = arith.constant 0 : index
    %2 = vector.load %arg2[%c0_1, %c0_2] : memref<32x128xbf16, #tpu.memory_space<vmem>>, vector<32x128xbf16>
    %3 = arith.extf %2 : vector<32x128xbf16> to vector<32x128xf32>
    %cst = arith.constant 0.000000e+00 : f32
    %4 = vector.broadcast %cst : f32 to vector<1x128xf32>
    %c0_3 = arith.constant 0 : index
    %c0_4 = arith.constant 0 : index
    %c0_5 = arith.constant 0 : index
    %5 = vector.load %arg5[%c0_3, %c0_4, %c0_5] : memref<2x64x1xf32, #tpu.memory_space<vmem>>, vector<1x64x1xf32>
    %6 = vector.shape_cast %5 : vector<1x64x1xf32> to vector<64x1xf32>
    %7 = vector.extract_strided_slice %6 {offsets = [0, 0], sizes = [32, 1], strides = [1, 1]} : vector<64x1xf32> to vector<32x1xf32>
    %8 = vector.extract_strided_slice %6 {offsets = [32, 0], sizes = [32, 1], strides = [1, 1]} : vector<64x1xf32> to vector<32x1xf32>
    %c0_6 = arith.constant 0 : index
    %c0_7 = arith.constant 0 : index
    %c0_8 = arith.constant 0 : index
    %9 = vector.load %arg3[%c0_6, %c0_7, %c0_8] : memref<2x32x16xbf16, #tpu.memory_space<vmem>>, vector<1x32x16xbf16>
    %10 = vector.shape_cast %9 : vector<1x32x16xbf16> to vector<32x16xbf16>
    %11 = arith.truncf %1 : vector<16x128xf32> to vector<16x128xbf16>
    %cst_9 = arith.constant dense<0.000000e+00> : vector<32x128xf32>
    %12 = tpu.matmul %10, %11, %cst_9 {dimension_numbers = #tpu.dot_dimension_numbers<[1], [0], [0], [1], [0, 0, 1, 1], [], []>} : vector<32x16xbf16>, vector<16x128xbf16>, vector<32x128xf32> -> vector<32x128xf32>
    %13 = vector.broadcast %7 : vector<32x1xf32> to vector<32x128xf32>
    %14 = arith.addf %12, %13 : vector<32x128xf32>
    %cst_10 = arith.constant 0.000000e+00 : f32
    %15 = vector.broadcast %cst_10 : f32 to vector<32x128xf32>
    %16 = arith.cmpf ogt, %14, %15 : vector<32x128xf32>
    %cst_11 = arith.constant 0.000000e+00 : f32
    %17 = vector.broadcast %cst_11 : f32 to vector<32x128xf32>
    %18 = arith.minimumf %14, %17 : vector<32x128xf32>
    %19 = math.exp %18 : vector<32x128xf32>
    %cst_12 = arith.constant 1.000000e+00 : f32
    %20 = vector.broadcast %cst_12 : f32 to vector<32x128xf32>
    %21 = arith.subf %19, %20 : vector<32x128xf32>
    %22 = arith.select %16, %14, %21 : vector<32x128xi1>, vector<32x128xf32>
    %23 = arith.addf %22, %3 : vector<32x128xf32>
    %c0_13 = arith.constant 0 : index
    %c0_14 = arith.constant 0 : index
    %c0_15 = arith.constant 0 : index
    %24 = vector.load %arg4[%c0_13, %c0_14, %c0_15] : memref<2x32x32xbf16, #tpu.memory_space<vmem>>, vector<1x32x32xbf16>
    %25 = vector.shape_cast %24 : vector<1x32x32xbf16> to vector<32x32xbf16>
    %26 = arith.truncf %23 : vector<32x128xf32> to vector<32x128xbf16>
    %cst_16 = arith.constant dense<0.000000e+00> : vector<32x128xf32>
    %27 = tpu.matmul %25, %26, %cst_16 {dimension_numbers = #tpu.dot_dimension_numbers<[1], [0], [0], [1], [0, 0, 1, 1], [], []>} : vector<32x32xbf16>, vector<32x128xbf16>, vector<32x128xf32> -> vector<32x128xf32>
    %28 = vector.broadcast %8 : vector<32x1xf32> to vector<32x128xf32>
    %29 = arith.addf %27, %28 : vector<32x128xf32>
    %30 = vector.extract_strided_slice %29 {offsets = [0, 0], sizes = [16, 128], strides = [1, 1]} : vector<32x128xf32> to vector<16x128xf32>
    %31 = vector.extract_strided_slice %29 {offsets = [16, 0], sizes = [16, 128], strides = [1, 1]} : vector<32x128xf32> to vector<16x128xf32>
    %32 = math.absf %31 : vector<16x128xf32>
    %cst_17 = arith.constant 0.000000e+00 : f32
    %33 = vector.broadcast %cst_17 : f32 to vector<16x128xf32>
    %34 = arith.subf %33, %32 : vector<16x128xf32>
    %35 = math.exp %34 : vector<16x128xf32>
    %cst_18 = arith.constant 0.000000e+00 : f32
    %36 = vector.broadcast %cst_18 : f32 to vector<16x128xf32>
    %37 = arith.minimumf %31, %36 : vector<16x128xf32>
    %cst_19 = arith.constant 1.000000e+00 : f32
    %38 = vector.broadcast %cst_19 : f32 to vector<16x128xf32>
    %39 = arith.addf %38, %35 : vector<16x128xf32>
    %40 = math.log %39 : vector<16x128xf32>
    %41 = arith.subf %37, %40 : vector<16x128xf32>
    %cst_20 = arith.constant 1.000000e+00 : f32
    %42 = vector.broadcast %cst_20 : f32 to vector<16x128xf32>
    %43 = arith.addf %42, %35 : vector<16x128xf32>
    %44 = tpu.reciprocal %43 {approx = true} : vector<16x128xf32> -> vector<16x128xf32>
    %cst_21 = arith.constant 0.000000e+00 : f32
    %45 = vector.broadcast %cst_21 : f32 to vector<16x128xf32>
    %46 = arith.cmpf oge, %31, %45 : vector<16x128xf32>
    %47 = arith.mulf %35, %44 : vector<16x128xf32>
    %48 = arith.select %46, %44, %47 : vector<16x128xi1>, vector<16x128xf32>
    %49 = arith.mulf %48, %1 : vector<16x128xf32>
    %cst_22 = arith.constant 1.000000e+00 : f32
    %50 = vector.broadcast %cst_22 : f32 to vector<16x128xf32>
    %51 = arith.subf %50, %48 : vector<16x128xf32>
    %52 = arith.mulf %51, %30 : vector<16x128xf32>
    %53 = arith.addf %49, %52 : vector<16x128xf32>
    %cst_23 = arith.constant dense<0.000000e+00> : vector<128xf32>
    %54 = vector.multi_reduction <add>, %41, %cst_23 [0] : vector<16x128xf32> to vector<128xf32>
    %55 = vector.shape_cast %54 : vector<128xf32> to vector<1x128xf32>
    %56 = arith.addf %4, %55 : vector<1x128xf32>
    %c1 = arith.constant 1 : index
    %c0_24 = arith.constant 0 : index
    %c0_25 = arith.constant 0 : index
    %57 = vector.load %arg5[%c1, %c0_24, %c0_25] : memref<2x64x1xf32, #tpu.memory_space<vmem>>, vector<1x64x1xf32>
    %58 = vector.shape_cast %57 : vector<1x64x1xf32> to vector<64x1xf32>
    %59 = vector.extract_strided_slice %58 {offsets = [0, 0], sizes = [32, 1], strides = [1, 1]} : vector<64x1xf32> to vector<32x1xf32>
    %60 = vector.extract_strided_slice %58 {offsets = [32, 0], sizes = [32, 1], strides = [1, 1]} : vector<64x1xf32> to vector<32x1xf32>
    %c1_26 = arith.constant 1 : index
    %c0_27 = arith.constant 0 : index
    %c0_28 = arith.constant 0 : index
    %61 = vector.load %arg3[%c1_26, %c0_27, %c0_28] : memref<2x32x16xbf16, #tpu.memory_space<vmem>>, vector<1x32x16xbf16>
    %62 = vector.shape_cast %61 : vector<1x32x16xbf16> to vector<32x16xbf16>
    %63 = arith.truncf %53 : vector<16x128xf32> to vector<16x128xbf16>
    %cst_29 = arith.constant dense<0.000000e+00> : vector<32x128xf32>
    %64 = tpu.matmul %62, %63, %cst_29 {dimension_numbers = #tpu.dot_dimension_numbers<[1], [0], [0], [1], [0, 0, 1, 1], [], []>} : vector<32x16xbf16>, vector<16x128xbf16>, vector<32x128xf32> -> vector<32x128xf32>
    %65 = vector.broadcast %59 : vector<32x1xf32> to vector<32x128xf32>
    %66 = arith.addf %64, %65 : vector<32x128xf32>
    %cst_30 = arith.constant 0.000000e+00 : f32
    %67 = vector.broadcast %cst_30 : f32 to vector<32x128xf32>
    %68 = arith.cmpf ogt, %66, %67 : vector<32x128xf32>
    %cst_31 = arith.constant 0.000000e+00 : f32
    %69 = vector.broadcast %cst_31 : f32 to vector<32x128xf32>
    %70 = arith.minimumf %66, %69 : vector<32x128xf32>
    %71 = math.exp %70 : vector<32x128xf32>
    %cst_32 = arith.constant 1.000000e+00 : f32
    %72 = vector.broadcast %cst_32 : f32 to vector<32x128xf32>
    %73 = arith.subf %71, %72 : vector<32x128xf32>
    %74 = arith.select %68, %66, %73 : vector<32x128xi1>, vector<32x128xf32>
    %75 = arith.addf %74, %3 : vector<32x128xf32>
    %c1_33 = arith.constant 1 : index
    %c0_34 = arith.constant 0 : index
    %c0_35 = arith.constant 0 : index
    %76 = vector.load %arg4[%c1_33, %c0_34, %c0_35] : memref<2x32x32xbf16, #tpu.memory_space<vmem>>, vector<1x32x32xbf16>
    %77 = vector.shape_cast %76 : vector<1x32x32xbf16> to vector<32x32xbf16>
    %78 = arith.truncf %75 : vector<32x128xf32> to vector<32x128xbf16>
    %cst_36 = arith.constant dense<0.000000e+00> : vector<32x128xf32>
    %79 = tpu.matmul %77, %78, %cst_36 {dimension_numbers = #tpu.dot_dimension_numbers<[1], [0], [0], [1], [0, 0, 1, 1], [], []>} : vector<32x32xbf16>, vector<32x128xbf16>, vector<32x128xf32> -> vector<32x128xf32>
    %80 = vector.broadcast %60 : vector<32x1xf32> to vector<32x128xf32>
    %81 = arith.addf %79, %80 : vector<32x128xf32>
    %82 = vector.extract_strided_slice %81 {offsets = [0, 0], sizes = [16, 128], strides = [1, 1]} : vector<32x128xf32> to vector<16x128xf32>
    %83 = vector.extract_strided_slice %81 {offsets = [16, 0], sizes = [16, 128], strides = [1, 1]} : vector<32x128xf32> to vector<16x128xf32>
    %84 = math.absf %83 : vector<16x128xf32>
    %cst_37 = arith.constant 0.000000e+00 : f32
    %85 = vector.broadcast %cst_37 : f32 to vector<16x128xf32>
    %86 = arith.subf %85, %84 : vector<16x128xf32>
    %87 = math.exp %86 : vector<16x128xf32>
    %cst_38 = arith.constant 0.000000e+00 : f32
    %88 = vector.broadcast %cst_38 : f32 to vector<16x128xf32>
    %89 = arith.minimumf %83, %88 : vector<16x128xf32>
    %cst_39 = arith.constant 1.000000e+00 : f32
    %90 = vector.broadcast %cst_39 : f32 to vector<16x128xf32>
    %91 = arith.addf %90, %87 : vector<16x128xf32>
    %92 = math.log %91 : vector<16x128xf32>
    %93 = arith.subf %89, %92 : vector<16x128xf32>
    %cst_40 = arith.constant 1.000000e+00 : f32
    %94 = vector.broadcast %cst_40 : f32 to vector<16x128xf32>
    %95 = arith.addf %94, %87 : vector<16x128xf32>
    %96 = tpu.reciprocal %95 {approx = true} : vector<16x128xf32> -> vector<16x128xf32>
    %cst_41 = arith.constant 0.000000e+00 : f32
    %97 = vector.broadcast %cst_41 : f32 to vector<16x128xf32>
    %98 = arith.cmpf oge, %83, %97 : vector<16x128xf32>
    %99 = arith.mulf %87, %96 : vector<16x128xf32>
    %100 = arith.select %98, %96, %99 : vector<16x128xi1>, vector<16x128xf32>
    %101 = arith.mulf %100, %53 : vector<16x128xf32>
    %cst_42 = arith.constant 1.000000e+00 : f32
    %102 = vector.broadcast %cst_42 : f32 to vector<16x128xf32>
    %103 = arith.subf %102, %100 : vector<16x128xf32>
    %104 = arith.mulf %103, %82 : vector<16x128xf32>
    %105 = arith.addf %101, %104 : vector<16x128xf32>
    %cst_43 = arith.constant dense<0.000000e+00> : vector<128xf32>
    %106 = vector.multi_reduction <add>, %93, %cst_43 [0] : vector<16x128xf32> to vector<128xf32>
    %107 = vector.shape_cast %106 : vector<128xf32> to vector<1x128xf32>
    %108 = arith.addf %56, %107 : vector<1x128xf32>
    %c0_44 = arith.constant 0 : index
    %c0_45 = arith.constant 0 : index
    %109 = vector.load %arg6[%c0_44, %c0_45] : memref<16x16xf32, #tpu.memory_space<vmem>>, vector<16x16xf32>
    %cst_46 = arith.constant dense<0.000000e+00> : vector<16x128xf32>
    %110 = tpu.matmul %109, %105, %cst_46 {dimension_numbers = #tpu.dot_dimension_numbers<[1], [0], [0], [1], [0, 0, 1, 1], [], []>} : vector<16x16xf32>, vector<16x128xf32>, vector<16x128xf32> -> vector<16x128xf32>
    %c0_47 = arith.constant 0 : index
    %c0_48 = arith.constant 0 : index
    %111 = vector.load %arg7[%c0_47, %c0_48] : memref<17x128xf32, #tpu.memory_space<vmem>>, vector<16x128xf32>
    tpu.vector_store %arg7[%c0_47, %c0_48], %110 {strides = array<i32>} : memref<17x128xf32, #tpu.memory_space<vmem>>, vector<16x128xf32>,
    %c16 = arith.constant 16 : index
    %c0_49 = arith.constant 0 : index
    %112 = vector.load %arg7[%c16, %c0_49] : memref<17x128xf32, #tpu.memory_space<vmem>>, vector<1x128xf32>
    tpu.vector_store %arg7[%c16, %c0_49], %108 {strides = array<i32>} : memref<17x128xf32, #tpu.memory_space<vmem>>, vector<1x128xf32>,
    return
  }
  func.func @transform_0(%arg0: i32) -> (i32, i32) {
    %c0_i32 = arith.constant 0 : i32
    %c0_i32_0 = arith.constant 0 : i32
    return %c0_i32, %arg0 : i32, i32
  }
  func.func @transform_1(%arg0: i32) -> (i32, i32) {
    %c0_i32 = arith.constant 0 : i32
    %c0_i32_0 = arith.constant 0 : i32
    return %c0_i32, %arg0 : i32, i32
  }
  func.func @transform_2(%arg0: i32) -> (i32, i32, i32) {
    %c0_i32 = arith.constant 0 : i32
    %c0_i32_0 = arith.constant 0 : i32
    %c0_i32_1 = arith.constant 0 : i32
    %c0_i32_2 = arith.constant 0 : i32
    return %c0_i32, %c0_i32_0, %c0_i32_1 : i32, i32, i32
  }
  func.func @transform_3(%arg0: i32) -> (i32, i32, i32) {
    %c0_i32 = arith.constant 0 : i32
    %c0_i32_0 = arith.constant 0 : i32
    %c0_i32_1 = arith.constant 0 : i32
    %c0_i32_2 = arith.constant 0 : i32
    return %c0_i32, %c0_i32_0, %c0_i32_1 : i32, i32, i32
  }
  func.func @transform_4(%arg0: i32) -> (i32, i32, i32) {
    %c0_i32 = arith.constant 0 : i32
    %c0_i32_0 = arith.constant 0 : i32
    %c0_i32_1 = arith.constant 0 : i32
    %c0_i32_2 = arith.constant 0 : i32
    return %c0_i32, %c0_i32_0, %c0_i32_1 : i32, i32, i32
  }
  func.func @transform_5(%arg0: i32) -> (i32, i32) {
    %c0_i32 = arith.constant 0 : i32
    %c0_i32_0 = arith.constant 0 : i32
    %c0_i32_1 = arith.constant 0 : i32
    return %c0_i32, %c0_i32_0 : i32, i32
  }
  func.func @transform_6(%arg0: i32) -> (i32, i32) {
    %c0_i32 = arith.constant 0 : i32
    %c0_i32_0 = arith.constant 0 : i32
    return %c0_i32, %arg0 : i32, i32
  }
}

</mosaic_0001>

<bundles_post_ra>
// kernel: tpu_custom_call.1
= control target key start
LH: loop header
LB: loop body
LE: loop exit
PB: predicated region body
PF: predicated region fallthrough
CT: control target
= control target key end

     0   :  { %11 = vsyncpa [#allocation5], 0  ;;  %s1672_s0 = inlined_call_operand.vmem [shape: bf16[16,256], index: 0, kind: input, shape index: {}]   ;;  %s1673_s1 = inlined_call_operand.vmem [shape: bf16[32,256], index: 1, kind: input, shape index: {}]   ;;  %s1674_s2 = inlined_call_operand.vmem [shape: bf16[2,32,16], index: 2, kind: input, shape index: {}]   ;;  %s1675_s3 = inlined_call_operand.vmem [shape: bf16[2,32,32], index: 3, kind: input, shape index: {}]   ;;  %s1676_s4 = inlined_call_operand.vmem [shape: f32[2,64,1], index: 4, kind: input, shape index: {}]   ;;  %s1677_s5 = inlined_call_operand.vmem [shape: f32[16,16], index: 5, kind: input, shape index: {}]   ;;  %s1678_s6 = inlined_call_operand.hbm [shape: f32[17,256], index: 6, kind: output, shape index: {}]  }
   0x1   :  { %13 = vsyncpa [#allocation5 + $0x1], 0  ;;  %s1416_s21 = smov 0   ;;  %s1418_s22 = smov 0  }
   0x2   :  { %s1420_s23 = smov 0   ;;  %s1422_s24 = smov 0  }
   0x3 LB: > { %s1093_s25 = sadd.s32 4294967295, %s1374_s24   ;;  %s1094_s26 = sadd.s32 4294967294, %s1374_s24   ;;  %s1374_s24 = sphi %s1422_s24, %s1685_s24   ;;  %s1370_s23 = sphi %s1420_s23, %s1684_s23   ;;  %s1366_s22 = sphi %s1418_s22, %s1683_s22   ;;  %s1362_s21 = sphi %s1416_s21, %s1682_s21  }
   0x4   : > { %s1439_s27 = sadd.s32 1, %s1374_s24   ;;  %s26_s28 = sadd.s32 1, %s1370_s23 }
   0x5   : > { %s23_s29 = ssub.s32 %s1374_s24, %s1439_s27  ;;  %p33_p0 = scmp.ne.s32.totalorder %s1370_s23, %s1366_s22 }
   0x6   : > { %p24_p1 = scmp.eq.s32.totalorder %s23_s29, 0  ;;  %p34_p2 = scmp.eq.s32.totalorder %s1374_s24, 0 }
   0x7   : > { %p173_p3 = scmp.eq.s32.totalorder %s1093_s25, 1  ;;  %p178_p4 = scmp.ne.s32.totalorder %s1366_s22, %s1362_s21 }
   0x8   : > { %s1452_s30 = scalar_select %p24_p1, %s1370_s23, %s26_s28  }
   0x9   : > { %p1454_p5 = por %p34_p2, %p33_p0  ;;  %p1458_p6 = por %p173_p3, %p33_p0 }
   0xa   : > { %p179_p7 = scmp.eq.s32.totalorder %s1094_s26, 1  ;;  %p1096_p9 = scmp.ge.s32.totalorder %s1374_s24, 2 }
   0xc   : > { %p1462_p8 = por %p179_p7, %p178_p4  ;;  %207 = sbr.rel (%p1096_p9) target bundleno = 33 (0x21), region = 32 }
  0x13   : > { %210 = sbr.rel (!%p1454_p5) target bundleno = 26 (0x1a), region = 36  ;;  %s212_s10 = sand.u32 (%p1454_p5), 1, %s1370_s23  }
  0x14   : > { %s1098_s11 = sshll.u32 (%p1454_p5), %s1374_s24, 2  ;;  %s1097_s12 = sshll.u32 (%p1454_p5), %s212_s10, 3 }
  0x15   : > { %s216_s15 = scalar_lea.vmem (%p1454_p5), %s1672_s0, %s1098_s11  ;;  %s214_s16 = scalar_lea.vmem (%p1454_p5), [#allocation2], %s1097_s12 }
  0x16   : > { %v232_v0 = vld [vmem:[%s216_s15] sm:$0xf] (%p1454_p5)  ;;  %v234_v1 = vld [vmem:[%s216_s15 + $0x8] sm:$0xf] (%p1454_p5) }
  0x17   : > { %233 = vst [vmem:[%s214_s16] sm:$0xf] (%p1454_p5), %v232_v0  ;;  %235 = vst [vmem:[%s214_s16 + $0x4] sm:$0xf] (%p1454_p5), %v234_v1 }
  0x1a PF: > { %262 = sbr.rel (!%p1454_p5) target bundleno = 33 (0x21), region = 77  ;;  %s264_s17 = sand.u32 (%p1454_p5), 1, %s1370_s23  }
  0x1b   : > { %s1100_s18 = sshll.u32 (%p1454_p5), %s1374_s24, 2  ;;  %s1099_s19 = sshll.u32 (%p1454_p5), %s264_s17, 4 }
  0x1c   : > { %s268_s28 = scalar_lea.vmem (%p1454_p5), %s1673_s1, %s1100_s18  ;;  %s266_s29 = scalar_lea.vmem (%p1454_p5), [#allocation3], %s1099_s19 }
  0x1d   : > { %v284_v2 = vld [vmem:[%s268_s28] sm:$0xf] (%p1454_p5)  ;;  %v286_v3 = vld [vmem:[%s268_s28 + $0x8] sm:$0xf] (%p1454_p5)  ;;  %v288_v4 = vld [vmem:[%s268_s28 + $0x10] sm:$0xf] (%p1454_p5) }
  0x1e   : > { %285 = vst [vmem:[%s266_s29] sm:$0xf] (%p1454_p5), %v284_v2  ;;  %287 = vst [vmem:[%s266_s29 + $0x4] sm:$0xf] (%p1454_p5), %v286_v3  ;;  %v290_v5 = vld [vmem:[%s268_s28 + $0x18] sm:$0xf] (%p1454_p5) }
  0x1f   : > { %289 = vst [vmem:[%s266_s29 + $0x8] sm:$0xf] (%p1454_p5), %v288_v4  ;;  %291 = vst [vmem:[%s266_s29 + $0xc] sm:$0xf] (%p1454_p5), %v290_v5 }
  0x21 PF: > { %p1101_p10 = scmp.ge.s32.totalorder %s1374_s24, 1  ;;  %p321_p11 = scmp.lt.s32.totalorder %s1374_s24, 3 }
  0x23   : > { %p322_p12 = pnand %p1101_p10, %p321_p11 }
  0x24   : > { %s1486_s7 = sand.u32 (!%p322_p12), 1, %s1366_s22   ;;  %v1263_v6 = vld [vmem:[%s1674_s2] sm:$0xff] (!%p322_p12)   ;;  %vm429_vm0 = vcmask (!%p322_p12), 130048   ;;  %v383_v8 = vld [vmem:[%s1676_s4 + $0x10] sm:$0xff] (!%p322_p12)  ;;  %v1376_v10 = vmov (!%p322_p12), 0   ;;  %v382_v11 = vld [vmem:[%s1676_s4 + $0x8] sm:$0xff] (!%p322_p12) }
  0x25   : > { %325 = sbr.rel (%p322_p12) target bundleno = 1291 (0x50b), region = 118  ;;  %s1102_s12 = sshll.u32 (!%p322_p12), %s1486_s7, 3  ;;  %1179 = vmatprep.mubr.msk.bf16.mxu0 (!%p322_p12), %vm429_vm0, %v1263_v6  ;;  %v381_v7 = vld [vmem:[%s1676_s4] sm:$0xff] (!%p322_p12)  ;;  %1260 = vset.pattern.permute.xlu0 (!%p322_p12), %v1376_v10  ;;  %v384_v12 = vld [vmem:[%s1676_s4 + $0x18] sm:$0xff] (!%p322_p12)  ;;  %v1264_v13 = vld [vmem:[%s1674_s2 + $0x8] sm:$0xff] (!%p322_p12)   ;;  %vm549_vm1 = vcmask (!%p322_p12), 261120  }
  0x26   : > { %s330_s17 = scalar_lea.vmem (!%p322_p12), [#allocation2], %s1102_s12  ;;  %1261 = vset.pattern.permute.xlu1 (!%p322_p12), %v1376_v10  ;;  %395 = vperm.xlu0 (!%p322_p12), %1260, %v381_v7   ;;  %v387_v14 = vld [vmem:[%s1676_s4 + $0x30] sm:$0xff] (!%p322_p12)  ;;  %v388_v15 = vld [vmem:[%s1676_s4 + $0x38] sm:$0xff] (!%p322_p12)  ;;  %v385_v16 = vld [vmem:[%s1676_s4 + $0x20] sm:$0xff] (!%p322_p12)  ;;  %s1103_s28 = sshll.u32 (!%p322_p12), %s1486_s7, 4 }
  0x27   : > { %v1499_v9 = vld [vmem:[%s330_s17] sm:$0xff] (!%p322_p12)   ;;  %405 = vperm.xlu1 (!%p322_p12), %1261, %v383_v8   ;;  %v1119_v20 = vld [vmem:[%s1676_s4 + $0x50] sm:$0xff] (!%p322_p12)  ;;  %v1120_v21 = vld [vmem:[%s1676_s4 + $0x58] sm:$0xff] (!%p322_p12)  ;;  %s337_s29 = scalar_lea.vmem (!%p322_p12), [#allocation3], %s1103_s28  ;;  %s1216_s10 = smul.u32 (!%p322_p12), 24, %s1486_s7 }
  0x28   : > { %1177 = vmatprep.subr.bf16.mxu0 (!%p322_p12), %v1499_v9  ;;  %v386_v17 = vld [vmem:[%s1676_s4 + $0x28] sm:$0xff] (!%p322_p12)  ;;  %v1117_v18 = vld [vmem:[%s1676_s4 + $0x40] sm:$0xff] (!%p322_p12)  ;;  %v1123_v22 = vld [vmem:[%s1676_s4 + $0x70] sm:$0xff] (!%p322_p12)  ;;  %s1147_s13 = sshll.u32 (!%p322_p12), %s1093_s25, 7  ;;  %s996_s17 = scalar_lea.sflag (!%p322_p12), [#allocation5], %s1486_s7 }
  0x29   : > { %1178 = vmatpush3.bf16.msra.mxu0 (!%p322_p12), %v1499_v9  ;;  %v1118_v19 = vld [vmem:[%s1676_s4 + $0x48] sm:$0xff] (!%p322_p12)  ;;  %v1124_v23 = vld [vmem:[%s1676_s4 + $0x78] sm:$0xff] (!%p322_p12)  ;;  %v1121_v24 = vld [vmem:[%s1676_s4 + $0x60] sm:$0xff] (!%p322_p12)  ;;  %s367_s11 = scalar_lea.vmem (!%p322_p12), [#allocation4], %s1216_s10  ;;  %s1628_s16 = scalar_lea.hbm (!%p322_p12), %s1678_s6, %s1147_s13 }
  0x2a   : > { %400 = vperm.xlu0 (!%p322_p12), %1260, %v382_v11   ;;  %v1122_v25 = vld [vmem:[%s1676_s4 + $0x68] sm:$0xff] (!%p322_p12)  ;;  %v1265_v26 = vld [vmem:[%s1675_s3] sm:$0xff] (!%p322_p12)   ;;  %v1267_v8 = vld [vmem:[%s1674_s2 + $0x10] sm:$0xff] (!%p322_p12)   ;;  %s1008_s12 = sshll.u32 (!%p322_p12), %s367_s11, 4  ;;  %s1377_s25 = smov (!%p322_p12), [#allocation4]   ;;  %s1623_s12 = int_to_ptr.vmem [resolvable:$true] %s1008_s12 }
  0x2b   : > { %410 = vperm.xlu1 (!%p322_p12), %1261, %v384_v12   ;;  %1187 = vmatprep.mubr.msk.bf16.mxu1 (!%p322_p12), %vm549_vm1, %v1265_v26  ;;  %v1554_v47 = vld [vmem:[%s337_s29 + $0x8] sm:$0xff] (!%p322_p12)   ;;  %v1556_v48 = vld [vmem:[%s337_s29] sm:$0xff] (!%p322_p12)   ;;  %s1312_s18 = scalar_lea.vmem (!%p322_p12), %s1623_s12, 384  ;;  %s1316_s19 = sshll.u32 (!%p322_p12), %s1377_s25, 4  ;;  %s1317_s19 = int_to_ptr.vmem [resolvable:$false] %s1316_s19 }
  0x2c   : > { %1180 = vmatmul.mubr.msk.bf16.vlgmr.msra.gmra.mrb[0].mxu0 %vm429_vm0, %v1264_v13  ;;  %v1156_v52 = vunpack.c.l.bf16 %v1554_v47  ;;  %v1152_v55 = vunpack.c.l.bf16 %v1556_v48  ;;  %v1157_v56 = vunpack.c.h.bf16 %v1554_v47  ;;  %v1153_v60 = vunpack.c.h.bf16 %v1556_v48  ;;  %v1266_v7 = vld [vmem:[%s1675_s3 + $0x8] sm:$0xff]   ;;  %v909_v47 = vld [vmem:[%s1677_s5] sm:$0xff]  ;;  %p1313_p13 = scmp.ne.s32.totalorder %s1623_s12, %s1312_s18  ;;  %s1318_s20 = scalar_lea.vmem %s1317_s19, 768 }
  0x2d   : > { %1193 = vmatprep.mubr.msk.bf16.mxu0 %vm429_vm0, %v1267_v8  ;;  %p1319_p2 = scmp.lt.s32.totalorder %s1623_s12, %s1317_s19  ;;  %p1320_p3 = scmp.lt.s32.totalorder %s1318_s20, %s1312_s18 }
  0x2e   : > { %531 = vperm.xlu0 %1260, %v387_v14   ;;  %p1314_p0 = pnand %p1313_p13, %p1458_p6 }
  0x2f   : > { %536 = vperm.xlu1 %1261, %v388_v15   ;;  %p1321_p4 = por %p1320_p3, %p1319_p2 }
  0x30   : > { %p1315_p1 = pneg %p1314_p0 }
  0x32   : > { %521 = vperm.xlu0 %1260, %v385_v16   ;;  %p1322_p5 = pnand %p1321_p4, %p1315_p1 }
  0x33   : > { %526 = vperm.xlu1 %1261, %v386_v17  }
  0x36   : > { %664 = vperm.xlu0 %1260, %v1117_v18  }
  0x37   : > { %669 = vperm.xlu1 %1261, %v1118_v19  }
  0x3a   : > { %674 = vperm.xlu0 %1260, %v1119_v20  }
  0x3b   : > { %679 = vperm.xlu1 %1261, %v1120_v21  }
  0x3e   : > { %794 = vperm.xlu0 %1260, %v1123_v22  }
  0x3f   : > { %799 = vperm.xlu1 %1261, %v1124_v23  }
  0x42   : > { %784 = vperm.xlu0 %1260, %v1121_v24  }
  0x43   : > { %789 = vperm.xlu1 %1261, %v1122_v25  }
  0xa5   : > { %v396_v28 = vpop.permute.xlu0 %395 }
  0xa6   : > { %v406_v27 = vpop.permute.xlu1 %405 }
  0xa9   : > { %v401_v35 = vpop.permute.xlu0 %400 }
  0xaa   : > { %v411_v32 = vpop.permute.xlu1 %410 }
  0xad   : > { %v532_v10 = vpop.permute.xlu0 %531 }
  0xae   : > { %v537_v14 = vpop.permute.xlu1 %536 }
  0xff   : > { %v1181_v29 = vpop.f32.mrb[0].mxu0 }
 0x100   : > { %v479_v30 = vadd.f32 %v1181_v29, %v406_v27  ;;  %v470_v31 = vpop.f32.mrb[1].mxu0 }
 0x101   : > { %v471_v33 = vadd.f32 %v470_v31, %v396_v28  ;;  %v1182_v34 = vpop.f32.mrb[2].mxu0 }
 0x102   : > { %v491_v36 = vmin.f32 %v479_v30, 0.0  ;;  %v482_v37 = vadd.f32 %v1182_v34, %v411_v32  ;;  %v473_v38 = vpop.f32.mrb[3].mxu0  ;;  %vm487_vm2 = vcmp.gt.f32.partialorder %v479_v30, 0.0  ;;  %v372_v34 = vunpack.c.h.bf16 %v1499_v9 }
 0x103   : > { %v489_v39 = vmin.f32 %v471_v33, 0.0  ;;  %v474_v40 = vadd.f32 %v473_v38, %v401_v35  ;;  %vm485_vm3 = vcmp.gt.f32.partialorder %v471_v33, 0.0 }
 0x104   : > { %v497_v41 = vmul.f32 1.442695, %v491_v36  ;;  %v492_v42 = vmin.f32 %v482_v37, 0.0  ;;  %vm488_vm4 = vcmp.gt.f32.partialorder %v482_v37, 0.0 }
 0x105   : > { %v493_v43 = vmul.f32 1.442695, %v489_v39  ;;  %v490_v44 = vmin.f32 %v474_v40, 0.0  ;;  %vm486_vm5 = vcmp.gt.f32.partialorder %v474_v40, 0.0 }
 0x106   : > { %1272 = vpow2.f32 %v497_v41  ;;  %v499_v45 = vmul.f32 1.442695, %v492_v42 }
 0x107   : > { %1274 = vpow2.f32 %v493_v43  ;;  %v495_v46 = vmul.f32 1.442695, %v490_v44  ;;  %v527_v44 = vpop.permute.xlu1 %526 }
 0x108   : > { %1276 = vpow2.f32 %v499_v45 }
 0x109   : > { %1278 = vpow2.f32 %v495_v46 }
 0x110   : > { %v1273_v49 = vpop.eup %1272 }
 0x111   : > { %v1275_v50 = vpop.eup %1274  ;;  %v1111_v51 = vadd.f32 -1.0, %v1273_v49 }
 0x112   : > { %v1277_v53 = vpop.eup %1276  ;;  %v1109_v54 = vadd.f32 -1.0, %v1275_v50 }
 0x113   : > { %v1279_v57 = vpop.eup %1278  ;;  %v507_v58 = vsel %vm487_vm2, %v479_v30, %v1111_v51  ;;  %v1112_v59 = vadd.f32 -1.0, %v1277_v53  ;;  %v371_v30 = vunpack.c.l.bf16 %v1499_v9 }
 0x114   : > { %v1110_v61 = vadd.f32 -1.0, %v1279_v57  ;;  %v505_v62 = vsel %vm485_vm3, %v471_v33, %v1109_v54  ;;  %v511_v1 = vadd.f32 %v1156_v52, %v507_v58 }
 0x115   : > { %v508_v63 = vsel %vm488_vm4, %v482_v37, %v1112_v59  ;;  %v509_v3 = vadd.f32 %v1152_v55, %v505_v62  ;;  %v522_v37 = vpop.permute.xlu0 %521 }
 0x116   : > { %v506_v0 = vsel %vm486_vm5, %v474_v40, %v1110_v61  ;;  %v512_v2 = vadd.f32 %v1157_v56, %v508_v63  ;;  %v1268_v63 = vld [vmem:[%s1674_s2 + $0x18] sm:$0xff]  }
 0x117   : > { %v510_v4 = vadd.f32 %v1153_v60, %v506_v0  ;;  %v1269_v0 = vld [vmem:[%s1675_s3 + $0x10] sm:$0xff]  }
 0x118   : > { %v518_v5 = vpack.c.bf16 %v512_v2, %v511_v1  ;;  %v670_v2 = vpop.permute.xlu1 %669 }
 0x119   : > { %v517_v6 = vpack.c.bf16 %v510_v4, %v509_v3  ;;  %v665_v1 = vpop.permute.xlu0 %664 }
 0x11b   : > { %1183 = vmatprep.subr.bf16.mxu1 %v517_v6 }
 0x11c   : > { %1184 = vmatpush3.bf16.msra.mxu1 %v517_v6 }
 0x11d   : > { %1185 = vmatprep.subr.bf16.mxu1 %v518_v5  ;;  %v675_v3 = vpop.permute.xlu0 %674 }
 0x120   : > { %1186 = vmatpush3.bf16.msra.mxu1 %v518_v5 }
 0x121   : > { %v795_v48 = vpop.permute.xlu0 %794 }
 0x123   : > { %1188 = vmatmul.mubr.msk.bf16.vlgmr.msra.gmra.mrb[0].mxu1 %vm549_vm1, %v1266_v7  ;;  %v680_v7 = vpop.permute.xlu1 %679 }
 0x124   : > { %1201 = vmatprep.mubr.msk.bf16.mxu1 %vm549_vm1, %v1269_v0 }
 0x1f6   : > { %v1189_v11 = vpop.f32.mrb[0].mxu1 }
 0x1f7   : > { %v599_v12 = vadd.f32 %v1189_v11, %v532_v10  ;;  %v590_v13 = vpop.f32.mrb[1].mxu1 }
 0x1f8   : > { %v1190_v15 = vpop.f32.mrb[2].mxu1  ;;  %v591_v41 = vadd.f32 %v590_v13, %v522_v37 }
 0x1f9   : > { %v605_v16 = vand.u32 2147483647, %v599_v12  ;;  %v602_v17 = vadd.f32 %v1190_v15, %v537_v14  ;;  %v593_v18 = vpop.f32.mrb[3].mxu1  ;;  %v613_v31 = vmin.f32 %v599_v12, 0.0  ;;  %vm625_vm6 = vcmp.ge.f32.partialorder %v599_v12, 0.0 }
 0x1fa   : > { %v594_v50 = vadd.f32 %v593_v18, %v527_v44 }
 0x1fb   : > { %v607_v19 = vsub.f32 0.0, %v605_v16  ;;  %v606_v20 = vand.u32 2147483647, %v602_v17  ;;  %v614_v39 = vmin.f32 %v602_v17, 0.0  ;;  %vm626_vm7 = vcmp.ge.f32.partialorder %v602_v17, 0.0 }
 0x1fd   : > { %v609_v21 = vmul.f32 1.442695, %v607_v19  ;;  %v608_v22 = vsub.f32 0.0, %v606_v20 }
 0x1ff   : > { %1280 = vpow2.f32 %v609_v21  ;;  %v611_v23 = vmul.f32 1.442695, %v608_v22 }
 0x201   : > { %1282 = vpow2.f32 %v611_v23 }
 0x209   : > { %v1281_v24 = vpop.eup %1280 }
 0x20a   : > { %v615_v25 = vadd.f32 1.0, %v1281_v24 }
 0x20b   : > { %v1283_v26 = vpop.eup %1282 }
 0x20c   : > { %1284 = vlog2.f32 %v615_v25  ;;  %v616_v27 = vadd.f32 1.0, %v1283_v26 }
 0x20d   : > { %1286 = vrcp.f32 %v615_v25 }
 0x20e   : > { %1288 = vlog2.f32 %v616_v27 }
 0x20f   : > { %1290 = vrcp.f32 %v616_v27 }
 0x216   : > { %v1285_v28 = vpop.eup %1284 }
 0x217   : > { %v1287_v29 = vpop.eup %1286  ;;  %v618_v32 = vmul.f32 0.6931472, %v1285_v28 }
 0x218   : > { %v1289_v33 = vpop.eup %1288  ;;  %v627_v35 = vmul.f32 %v1287_v29, %v1281_v24 }
 0x219   : > { %v1291_v36 = vpop.eup %1290  ;;  %v621_v38 = vsub.f32 %v613_v31, %v618_v32  ;;  %v620_v40 = vmul.f32 0.6931472, %v1289_v33 }
 0x21a   : > { %v629_v42 = vsel %vm625_vm6, %v1287_v29, %v627_v35  ;;  %v628_v43 = vmul.f32 %v1291_v36, %v1283_v26 }
 0x21b   : > { %v631_v45 = vmul.f32 %v629_v42, %v371_v30  ;;  %v633_v46 = vsub.f32 1.0, %v629_v42  ;;  %v622_v49 = vsub.f32 %v614_v39, %v620_v40  ;;  %v1270_v40 = vld [vmem:[%s1675_s3 + $0x18] sm:$0xff]  }
 0x21c   : > { %v630_v51 = vsel %vm626_vm7, %v1291_v36, %v628_v43 }
 0x21d   : > { %v635_v53 = vmul.f32 %v633_v46, %v591_v41  ;;  %v1580_v54 = vadd.f32 %v622_v49, %v621_v38  ;;  %v632_v9 = vmul.f32 %v630_v51, %v372_v34  ;;  %v634_v57 = vsub.f32 1.0, %v630_v51 }
 0x21f   : > { %v1582_v58 = vadd.f32 %v635_v53, %v631_v45  ;;  %v636_v59 = vmul.f32 %v634_v57, %v594_v50 }
 0x221   : > { %v1584_v61 = vadd.f32 %v636_v59, %v632_v9 }
 0x223   : > { %v661_v62 = vpack.c.bf16 %v1584_v61, %v1582_v58 }
 0x225   : > { %1191 = vmatprep.subr.bf16.mxu0 %v661_v62 }
 0x226   : > { %1192 = vmatpush3.bf16.msra.mxu0 %v661_v62  ;;  %v640_v62 = vrot.slane %v1580_v54, 4 }
 0x229   : > { %1194 = vmatmul.mubr.msk.bf16.vlgmr.msra.gmra.mrb[4].mxu0 %vm429_vm0, %v1268_v63 }
 0x22a   : > { %1209 = vmatprep.mubr.msk.f32.mxu0 %vm429_vm0, %v909_v47 }
 0x2fc   : > { %v1195_v4 = vpop.f32.mrb[4].mxu0 }
 0x2fd   : > { %v741_v5 = vadd.f32 %v1195_v4, %v675_v3  ;;  %v732_v6 = vpop.f32.mrb[5].mxu0  ;;  %v641_v3 = vadd.f32 %v640_v62, %v1580_v54 }
 0x2fe   : > { %v733_v8 = vadd.f32 %v732_v6, %v665_v1  ;;  %v1196_v10 = vpop.f32.mrb[6].mxu0  ;;  %v785_v6 = vpop.permute.xlu0 %784 }
 0x2ff   : > { %v753_v11 = vmin.f32 %v741_v5, 0.0  ;;  %v744_v12 = vadd.f32 %v1196_v10, %v680_v7  ;;  %v735_v13 = vpop.f32.mrb[7].mxu0  ;;  %vm749_vm8 = vcmp.gt.f32.partialorder %v741_v5, 0.0 }
 0x300   : > { %v751_v14 = vmin.f32 %v733_v8, 0.0  ;;  %v736_v15 = vadd.f32 %v735_v13, %v670_v2  ;;  %vm747_vm9 = vcmp.gt.f32.partialorder %v733_v8, 0.0 }
 0x301   : > { %v759_v16 = vmul.f32 1.442695, %v753_v11  ;;  %v754_v17 = vmin.f32 %v744_v12, 0.0  ;;  %vm750_vm10 = vcmp.gt.f32.partialorder %v744_v12, 0.0 }
 0x302   : > { %v755_v18 = vmul.f32 1.442695, %v751_v14  ;;  %v752_v19 = vmin.f32 %v736_v15, 0.0  ;;  %vm748_vm11 = vcmp.gt.f32.partialorder %v736_v15, 0.0 }
 0x303   : > { %1292 = vpow2.f32 %v759_v16  ;;  %v761_v20 = vmul.f32 1.442695, %v754_v17 }
 0x304   : > { %1294 = vpow2.f32 %v755_v18  ;;  %v757_v21 = vmul.f32 1.442695, %v752_v19  ;;  %v642_v18 = vrot.slane %v641_v3, 2 }
 0x305   : > { %1296 = vpow2.f32 %v761_v20 }
 0x306   : > { %1298 = vpow2.f32 %v757_v21 }
 0x30d   : > { %v1293_v22 = vpop.eup %1292 }
 0x30e   : > { %v1295_v23 = vpop.eup %1294  ;;  %v1135_v24 = vadd.f32 -1.0, %v1293_v22 }
 0x30f   : > { %v1297_v25 = vpop.eup %1296  ;;  %v1133_v26 = vadd.f32 -1.0, %v1295_v23 }
 0x310   : > { %v1299_v27 = vpop.eup %1298  ;;  %v769_v28 = vsel %vm749_vm8, %v741_v5, %v1135_v24  ;;  %v1136_v29 = vadd.f32 -1.0, %v1297_v25 }
 0x311   : > { %v767_v30 = vsel %vm747_vm9, %v733_v8, %v1133_v26  ;;  %v1134_v31 = vadd.f32 -1.0, %v1299_v27  ;;  %v773_v34 = vadd.f32 %v1156_v52, %v769_v28  ;;  %v643_v28 = vadd.f32 %v642_v18, %v641_v3 }
 0x312   : > { %v770_v32 = vsel %vm750_vm10, %v744_v12, %v1136_v29  ;;  %v771_v36 = vadd.f32 %v1152_v55, %v767_v30 }
 0x313   : > { %v768_v33 = vsel %vm748_vm11, %v736_v15, %v1134_v31  ;;  %v774_v35 = vadd.f32 %v1157_v56, %v770_v32 }
 0x314   : > { %v772_v37 = vadd.f32 %v1153_v60, %v768_v33  ;;  %v800_v60 = vpop.permute.xlu1 %799 }
 0x315   : > { %v781_v38 = vpack.c.bf16 %v774_v35, %v773_v34  ;;  %v644_v34 = vrot.slane %v643_v28, 1 }
 0x316   : > { %v780_v39 = vpack.c.bf16 %v772_v37, %v771_v36 }
 0x318   : > { %1197 = vmatprep.subr.bf16.mxu1 %v780_v39  ;;  %v790_v14 = vpop.permute.xlu1 %789 }
 0x319   : > { %1198 = vmatpush3.bf16.msra.mxu1 %v780_v39 }
 0x31a   : > { %1199 = vmatprep.subr.bf16.mxu1 %v781_v38 }
 0x31d   : > { %1200 = vmatpush3.bf16.msra.mxu1 %v781_v38 }
 0x320   : > { %1202 = vmatmul.mubr.msk.bf16.vlgmr.msra.gmra.mrb[4].mxu1 %vm549_vm1, %v1270_v40 }
 0x3f3   : > { %v1203_v52 = vpop.f32.mrb[4].mxu1 }
 0x3f4   : > { %v861_v55 = vadd.f32 %v1203_v52, %v795_v48  ;;  %v852_v56 = vpop.f32.mrb[5].mxu1 }
 0x3f5   : > { %v1204_v41 = vpop.f32.mrb[6].mxu1  ;;  %v853_v11 = vadd.f32 %v852_v56, %v785_v6 }
 0x3f6   : > { %v867_v42 = vand.u32 2147483647, %v861_v55  ;;  %v864_v43 = vadd.f32 %v1204_v41, %v800_v60  ;;  %v855_v44 = vpop.f32.mrb[7].mxu1  ;;  %v875_v7 = vmin.f32 %v861_v55, 0.0  ;;  %vm887_vm12 = vcmp.ge.f32.partialorder %v861_v55, 0.0 }
 0x3f7   : > { %v856_v19 = vadd.f32 %v855_v44, %v790_v14 }
 0x3f8   : > { %v869_v45 = vsub.f32 0.0, %v867_v42  ;;  %v868_v46 = vand.u32 2147483647, %v864_v43  ;;  %v876_v8 = vmin.f32 %v864_v43, 0.0  ;;  %vm888_vm13 = vcmp.ge.f32.partialorder %v864_v43, 0.0 }
 0x3fa   : > { %v871_v49 = vmul.f32 1.442695, %v869_v45  ;;  %v870_v50 = vsub.f32 0.0, %v868_v46 }
 0x3fc   : > { %1300 = vpow2.f32 %v871_v49  ;;  %v873_v51 = vmul.f32 1.442695, %v870_v50 }
 0x3fe   : > { %1302 = vpow2.f32 %v873_v51 }
 0x406   : > { %v1301_v53 = vpop.eup %1300 }
 0x407   : > { %v877_v9 = vadd.f32 1.0, %v1301_v53 }
 0x408   : > { %v1303_v57 = vpop.eup %1302 }
 0x409   : > { %1304 = vlog2.f32 %v877_v9  ;;  %v878_v59 = vadd.f32 1.0, %v1303_v57 }
 0x40a   : > { %1306 = vrcp.f32 %v877_v9 }
 0x40b   : > { %1308 = vlog2.f32 %v878_v59 }
 0x40c   : > { %1310 = vrcp.f32 %v878_v59 }
 0x413   : > { %v1305_v63 = vpop.eup %1304 }
 0x414   : > { %v1307_v0 = vpop.eup %1306  ;;  %v880_v1 = vmul.f32 0.6931472, %v1305_v63 }
 0x415   : > { %v1309_v2 = vpop.eup %1308  ;;  %v889_v4 = vmul.f32 %v1307_v0, %v1301_v53 }
 0x416   : > { %v1311_v5 = vpop.eup %1310  ;;  %v882_v10 = vmul.f32 0.6931472, %v1309_v2  ;;  %v883_v15 = vsub.f32 %v875_v7, %v880_v1 }
 0x417   : > { %v891_v12 = vsel %vm887_vm12, %v1307_v0, %v889_v4  ;;  %v890_v13 = vmul.f32 %v1311_v5, %v1303_v57 }
 0x418   : > { %v895_v16 = vsub.f32 1.0, %v891_v12  ;;  %v884_v17 = vsub.f32 %v876_v8, %v882_v10  ;;  %v893_v54 = vmul.f32 %v891_v12, %v1582_v58  ;;  %v910_v58 = vld [vmem:[%s1677_s5 + $0x8] sm:$0xff] }
 0x419   : > { %v892_v20 = vsel %vm888_vm13, %v1311_v5, %v890_v13 }
 0x41a   : > { %v897_v21 = vmul.f32 %v895_v16, %v853_v11  ;;  %v901_v22 = vadd.f32 %v884_v17, %v883_v15  ;;  %v896_v23 = vsub.f32 1.0, %v892_v20  ;;  %v894_v26 = vmul.f32 %v892_v20, %v1584_v61 }
 0x41b   : > { %v645_v61 = vadd.f32 %v644_v34, %v643_v28 }
 0x41c   : > { %v899_v24 = vadd.f32 %v897_v21, %v893_v54  ;;  %v902_v25 = vrot.slane %v901_v22, 4  ;;  %v898_v27 = vmul.f32 %v896_v23, %v856_v19 }
 0x41e   : > { %v903_v29 = vadd.f32 %v902_v25, %v901_v22  ;;  %v900_v30 = vadd.f32 %v898_v27, %v894_v26 }
 0x420   : > { %v904_v31 = vrot.slane %v903_v29, 2  ;;  %v1212_v32 = vpack.c.bf16 %v900_v30, %v899_v24 }
 0x422   : > { %v905_v33 = vadd.f32 %v904_v31, %v903_v29  ;;  %1213 = vmatprep.subr.bf16.mxu0 %v1212_v32 }
 0x423   : > { %1215 = vmatpush3.bf16.msra.mxu0 %v1212_v32 }
 0x424   : > { %v906_v35 = vrot.slane %v905_v33, 1 }
 0x426   : > { %1210 = vmatmul.mubr.msk.f32.vlgmr.msra.gmra.mrb[8].mxu0 %vm429_vm0, %v910_v58  ;;  %v907_v36 = vadd.f32 %v906_v35, %v905_v33 }
 0x428   : > { %v908_v37 = vadd.f32 %v907_v36, %v645_v61 }
 0x42a   : > { %994 = vst [vmem:[%s367_s11 + $0x10] sm:$0x1] %v908_v37 }
 0x4f9   : > { %v1211_v38 = vpop.f32.mrb[8].mxu0 }
 0x4fa   : > { %993 = vst [vmem:[%s367_s11 + $0x8] sm:$0xff] %v1211_v38  ;;  %v983_v39 = vpop.f32.mrb[9].mxu0 }
 0x4fb   : > { %992 = vst [vmem:[%s367_s11] sm:$0xff] %v983_v39 }
 0x4fc   : > { %1325 = shalt.err (!%p1322_p5)
}
 0x4fd   : > { %s1326_s26 = scalar_lea.hbm %s1628_s16, 384  ;;  %s1330_s10 = scalar_lea.hbm %s1678_s6, 768 }
 0x4fe   : > { %p1327_p7 = scmp.ne.s32.totalorder %s1628_s16, %s1326_s26  ;;  %p1331_p12 = scmp.lt.u32.totalorder %s1628_s16, %s1678_s6 }
 0x4ff   : > { %p1332_p13 = scmp.lt.u32.totalorder %s1330_s10, %s1326_s26  ;;  %p1334_p1 = scmp.lt.u32.totalorder %s1326_s26, %s1628_s16 }
 0x500   : > { %p1328_p10 = pnand %p1327_p7, %p1458_p6 }
 0x501   : > { %p1333_p0 = por %p1332_p13, %p1331_p12 }
 0x502   : > { %p1329_p11 = pneg %p1328_p10 }
 0x503   : > { %p1335_p2 = por %p1334_p1, %p1333_p0 }
 0x505   : > { %p1336_p3 = pnand %p1335_p2, %p1329_p11 }
 0x507   : > { %1339 = shalt.err (!%p1336_p3)
}
 0x508   : > { %s1378_s14 = smov 128   ;;  %s1379_s15 = smov 256  }
 0x509   : > { %s1380_s18 = smov 8  }
 0x50a   : > { %1217 = dma.vmem_to_hbm [thread:$0]  (%p1458_p6), %s1623_s12, 384, %s1628_s16, %s996_s17, %s1378_s14, %s1379_s15, %s1380_s18  }
 0x50b PF: > { %s1023_s25 = sand.u32 1, %s1362_s21   ;;  %p1220_p4 = pnand %p1096_p9, %p1462_p8 }
 0x50c   : > { %s1024_s19 = scalar_lea.sflag [#allocation5], %s1023_s25 }
 0x50d   : > { %1357 = dma.done.wait (!%p1220_p4), %s1024_s19, 384  }
 0x50e   : > { %1359 = vsyncadd (!%p1220_p4), %s1024_s19, 4294966912  ;;  %p16_p5 = scmp.ge.s32.totalorder %s1439_s27, 4   ;;  %s1682_s21 = smov %s1366_s22 }
 0x50f   : > { %s1683_s22 = smov %s1370_s23  ;;  %s1684_s23 = smov %s1452_s30 }
 0x510   : > { %s1685_s24 = smov %s1439_s27  ;;  %18 = sbr.rel (!%p16_p5) target bundleno = 3 (0x3), region = 177 }
 0x517   :  { %1029 = vsyncpa [#allocation5], 1 }
 0x518   :  { %1031 = vsyncpa [#allocation5 + $0x1], 1 }

</bundles_post_ra>
